<compile_context>
chip_gen: v5e
topology: v5e:2x2
jax: 0.10.0
libtpu: 0.0.40
codegen_flags: <defaults>
</compile_context>

<pallas_src>
import functools

import jax
import jax.numpy as jnp
from jax.experimental import pallas as pl
from jax.experimental.pallas import tpu as pltpu


# --------------------------------------------------------------------------- #
# Kernel
# --------------------------------------------------------------------------- #
def _mha_colsum_kernel(q_ref, k_ref, o_ref, *, scale):
    # q_ref: (G, TN, D)   k_ref: (G, D, M)   o_ref: (G, M) f32 (resident over j)
    j = pl.program_id(1)

    # Scale q (small) instead of the (G, TN, M) scores (large). Multiply, not
    # divide, exactly as the module does.
    q = q_ref[...] * scale                                          # (G, TN, D)

    # scores[g, n, m] = sum_d q[g, n, d] * k[g, d, m]; MXU accumulates in f32.
    s = jnp.einsum('gnd,gdm->gnm', q, k_ref[...],
                   preferred_element_type=jnp.float32)              # (G, TN, M)

    # Softmax over m (un-tiled), all in f32.
    m_max = jnp.max(s, axis=-1, keepdims=True)                      # (G, TN, 1)
    p = jnp.exp(s - m_max)                                          # (G, TN, M)
    denom = jnp.sum(p, axis=-1, keepdims=True)                      # (G, TN, 1)
    inv = pl.reciprocal(denom, approx=False)                        # exact recip

    # Column sums over this n-block: all the second einsum actually contracts.
    partial = jnp.sum(p * inv, axis=1)                              # (G, M) dense

    @pl.when(j == 0)
    def _():
        o_ref[...] = partial

    @pl.when(j > 0)
    def _():
        o_ref[...] += partial


# --------------------------------------------------------------------------- #
# Tiling / VMEM heuristics
# --------------------------------------------------------------------------- #
def _vmem_capacity_bytes():
    try:
        info = pltpu.get_tpu_info()
        cap = getattr(info, "vmem_capacity_bytes", None)
        if cap:
            return int(cap)
    except Exception:
        pass
    return 64 * 1024 * 1024  # conservative fallback (v7x per-TC VMEM)


def _num_tensorcores():
    try:
        info = pltpu.get_tpu_info()
        for name in ("num_cores", "core_count", "tensorcore_count",
                     "num_tensor_cores"):
            val = getattr(info, name, None)
            if val:
                return int(val)
    except Exception:
        pass
    return 1


def _step_vmem_bytes(g, tn, m, d, itemsize):
    """Per-grid-step VMEM footprint, accounting for (8, 128) layout padding."""
    lane = lambda x: -(-x // 128) * 128
    sub = lambda x: -(-x // 8) * 8
    q_tile = g * sub(tn) * lane(d) * itemsize            # (G, TN, D) input
    k_tile = g * sub(d) * lane(m) * itemsize             # (G, D, M) input
    o_tile = sub(g) * lane(m) * 4                        # (G, M) f32 output
    inter = g * sub(tn) * lane(m) * 4                    # one f32 (G, TN, M)
    # double-buffered input/output windows + ~2 live (scores, p) intermediates
    return 2 * (q_tile + k_tile + o_tile) + 2 * inter


def _pick_tiling(bh, n, m, d, itemsize, budget, n_cores):
    """Pick (heads per step G, n-block size TN).

    G must be a divisor of bh and either a multiple of 8 (dense output block)
    or bh itself; TN must divide n and be a multiple of 8 or n itself.
    Prefer the largest G, then the largest TN, that fits the VMEM budget.
    """
    def legal_g(g):
        return bh % g == 0 and (g == bh or g % 8 == 0)

    def legal_tn(tn):
        return n % tn == 0 and (tn == n or tn % 8 == 0)

    g_cands = [g for g in range(bh, 0, -1) if legal_g(g)]
    tn_cands = [tn for tn in range(n, 0, -1) if legal_tn(tn)]

    g_sel, tn_sel = g_cands[-1], tn_cands[-1]  # smallest legal fallback
    found = False
    for g in g_cands:
        for tn in tn_cands:
            if _step_vmem_bytes(g, tn, m, d, itemsize) <= budget:
                g_sel, tn_sel = g, tn
                found = True
                break
        if found:
            break

    # Multi-TensorCore parts shard the leading ("parallel") grid axis across
    # cores: prefer an even number of head-group steps when bh allows.
    if n_cores >= 2:
        for g in g_cands:
            if g <= g_sel and (bh // g) % 2 == 0:
                g_sel = g
                break

    return g_sel, tn_sel


# --------------------------------------------------------------------------- #
# Wrapper
# --------------------------------------------------------------------------- #
def multi_head_attention(q, k, v, *, n_heads, heads_per_step=None,
                         n_block_size=None):
    """Pallas implementation of MultiHeadAttention.forward.

    q: (B, H, N, D), k/v: (B, H, M, D); returns (B, H, M, D) in q.dtype.
    """
    B, H, N, D = q.shape
    _, _, M, _ = k.shape
    dim = H * D
    scale = float((dim // n_heads) ** 0.5)
    BH = B * H

    q2 = q.reshape(BH, N, D)                              # (BH, N, D)
    # Lane-dense k layout: (BH, D, M) -> tile rows are full-M lanes and the MXU
    # RHS is already (contract, out). One-time XLA transpose (layout plumbing).
    k2 = k.transpose(0, 1, 3, 2).reshape(BH, D, M)        # (BH, D, M)

    cap = _vmem_capacity_bytes()
    budget = min(cap // 2, 64 * 1024 * 1024)              # ~32 MiB v7x, 64 MiB v5e/v6e
    vmem_limit = min(int(cap * 0.75), 112 * 1024 * 1024)

    G, TN = _pick_tiling(BH, N, M, D, q.dtype.itemsize, budget,
                         _num_tensorcores())
    if heads_per_step is not None:
        G = heads_per_step
    if n_block_size is not None:
        TN = n_block_size
    assert BH % G == 0, (BH, G)
    assert N % TN == 0, (N, TN)
    # TODO(synk): if BH/N ever stop being divisible by a legal G/TN, pad and
    # mask the tail block instead of falling back to tiny steps.

    kernel = functools.partial(_mha_colsum_kernel, scale=scale)

    col_sum = pl.pallas_call(
        kernel,
        out_shape=jax.ShapeDtypeStruct((BH, M), jnp.float32),
        grid_spec=pltpu.PrefetchScalarGridSpec(
            num_scalar_prefetch=0,
            grid=(BH // G, N // TN),                      # (heads, n-blocks)
            in_specs=[
                pl.BlockSpec((G, TN, D), lambda i, j: (i, j, 0)),   # q
                pl.BlockSpec((G, D, M), lambda i, j: (i, 0, 0)),    # k (resident over j)
            ],
            out_specs=pl.BlockSpec((G, M), lambda i, j: (i, 0)),    # accumulator over j
        ),
        compiler_params=pltpu.CompilerParams(
            dimension_semantics=("parallel", "arbitrary"),
            vmem_limit_bytes=vmem_limit,
        ),
    )(q2, k2)                                             # (BH, M) f32

    col_sum = col_sum.reshape(B, H, M)
    # out[b,h,m,d] = v[b,h,m,d] * sum_n softmax(scores)[b,h,n,m]
    # (purely elementwise; XLA fuses it with the surrounding reshape/cast).
    out = (v.astype(jnp.float32) * col_sum[..., None]).astype(q.dtype)
    return out


# --------------------------------------------------------------------------- #
# Reference + test
# --------------------------------------------------------------------------- #
def _reference(q, k, v, *, n_heads):
    """Pure-JAX transcription of the PyTorch forward for verification."""
    B, H, N, D = q.shape
    dim = H * D
    scale = (dim // n_heads) ** 0.5
    scores = jnp.einsum('bhnd,bhmd->bhnm', q, k) * scale
    scores = jax.nn.softmax(scores, axis=-1)
    out = jnp.einsum('bhnm,bhmd->bhmd', scores, v)
    return out


if __name__ == "__main__":
    # Small shapes consistent with the module: dim=32, n_heads=4 -> head_dim=8.
    B, H, N, D = 2, 4, 8, 8      # q: (B, H, N, D)
    M = 8                        # k, v: (B, H, M, D)
    n_heads = H

    key = jax.random.PRNGKey(0)
    kq, kk, kv = jax.random.split(key, 3)
    q = jax.random.normal(kq, (B, H, N, D), dtype=jnp.float32)
    k = jax.random.normal(kk, (B, H, M, D), dtype=jnp.float32)
    v = jax.random.normal(kv, (B, H, M, D), dtype=jnp.float32)

    out = multi_head_attention(q, k, v, n_heads=n_heads)
    out = jax.block_until_ready(out)

    ref = _reference(q, k, v, n_heads=n_heads)
    assert out.shape == ref.shape, (out.shape, ref.shape)
    assert jnp.allclose(out, ref, atol=1e-5, rtol=1e-5), (
        float(jnp.max(jnp.abs(out - ref)))
    )

    print("KERNEL_OK")
</pallas_src>

<mosaic_0001>
module attributes {stable_mosaic.version = 11 : i64} {
  func.func @_mha_colsum_kernel(%arg0: i32, %arg1: i32, %arg2: memref<8x8x8xf32, #tpu.memory_space<vmem>>, %arg3: memref<8x8x8xf32, #tpu.memory_space<vmem>>, %arg4: memref<8x8xf32, #tpu.memory_space<vmem>>) attributes {dimension_semantics = [#tpu.dimension_semantics<parallel>, #tpu.dimension_semantics<arbitrary>], iteration_bounds = array<i64: 1, 1>, scalar_prefetch = 0 : i64, scratch_operands = 0 : i64, tpu.core_type = #tpu.core_type<tc>, window_params = [{transform_indices = @transform_0, window_bounds = array<i64: 8, 8, 8>}, {transform_indices = @transform_1, window_bounds = array<i64: 8, 8, 8>}, {transform_indices = @transform_2, window_bounds = array<i64: 8, 8>}]} {
    %c0 = arith.constant 0 : index
    %c0_0 = arith.constant 0 : index
    %c0_1 = arith.constant 0 : index
    %0 = vector.load %arg2[%c0, %c0_0, %c0_1] : memref<8x8x8xf32, #tpu.memory_space<vmem>>, vector<8x8x8xf32>
    %cst = arith.constant 2.82842708 : f32
    %1 = vector.broadcast %cst : f32 to vector<8x8x8xf32>
    %2 = arith.mulf %0, %1 : vector<8x8x8xf32>
    %c0_2 = arith.constant 0 : index
    %c0_3 = arith.constant 0 : index
    %c0_4 = arith.constant 0 : index
    %3 = vector.load %arg3[%c0_2, %c0_3, %c0_4] : memref<8x8x8xf32, #tpu.memory_space<vmem>>, vector<8x8x8xf32>
    "tpu.trace_start"() <{level = 10 : i32, message = "gnd,gdm->gnm"}> : () -> ()
    %cst_5 = arith.constant dense<0.000000e+00> : vector<8x8x8xf32>
    %4 = tpu.matmul %2, %3, %cst_5 {dimension_numbers = #tpu.dot_dimension_numbers<[2], [1], [1], [2], [0, 0, 0, 1, 1, 2], [0], [0]>} : vector<8x8x8xf32>, vector<8x8x8xf32>, vector<8x8x8xf32> -> vector<8x8x8xf32>
    "tpu.trace_stop"() : () -> ()
    %cst_6 = arith.constant dense<0xFF800000> : vector<8x8xf32>
    %5 = vector.multi_reduction <maximumf>, %4, %cst_6 [2] : vector<8x8x8xf32> to vector<8x8xf32>
    %6 = vector.shape_cast %5 : vector<8x8xf32> to vector<8x8x1xf32>
    %7 = vector.broadcast %6 : vector<8x8x1xf32> to vector<8x8x8xf32>
    %8 = arith.subf %4, %7 : vector<8x8x8xf32>
    %9 = math.exp %8 : vector<8x8x8xf32>
    %cst_7 = arith.constant dense<0.000000e+00> : vector<8x8xf32>
    %10 = vector.multi_reduction <add>, %9, %cst_7 [2] : vector<8x8x8xf32> to vector<8x8xf32>
    %11 = vector.shape_cast %10 : vector<8x8xf32> to vector<8x8x1xf32>
    %12 = tpu.reciprocal %11 : vector<8x8x1xf32> -> vector<8x8x1xf32>
    %13 = vector.broadcast %12 : vector<8x8x1xf32> to vector<8x8x8xf32>
    %14 = arith.mulf %9, %13 : vector<8x8x8xf32>
    %cst_8 = arith.constant dense<0.000000e+00> : vector<8x8xf32>
    %15 = vector.multi_reduction <add>, %14, %cst_8 [1] : vector<8x8x8xf32> to vector<8x8xf32>
    %c0_i32 = arith.constant 0 : i32
    %16 = arith.cmpi eq, %arg1, %c0_i32 : i32
    %17 = arith.extui %16 : i1 to i32
    %c0_i32_9 = arith.constant 0 : i32
    %18 = arith.cmpi ne, %17, %c0_i32_9 : i32
    scf.if %18 {
      %c0_12 = arith.constant 0 : index
      %c0_13 = arith.constant 0 : index
      %22 = vector.load %arg4[%c0_12, %c0_13] : memref<8x8xf32, #tpu.memory_space<vmem>>, vector<8x8xf32>
      tpu.vector_store %arg4[%c0_12, %c0_13], %15 {strides = array<i32>} : memref<8x8xf32, #tpu.memory_space<vmem>>, vector<8x8xf32>,
    } else {
    }
    %c0_i32_10 = arith.constant 0 : i32
    %19 = arith.cmpi sgt, %arg1, %c0_i32_10 : i32
    %20 = arith.extui %19 : i1 to i32
    %c0_i32_11 = arith.constant 0 : i32
    %21 = arith.cmpi ne, %20, %c0_i32_11 : i32
    scf.if %21 {
      %c0_12 = arith.constant 0 : index
      %c0_13 = arith.constant 0 : index
      %22 = vector.load %arg4[%c0_12, %c0_13] : memref<8x8xf32, #tpu.memory_space<vmem>>, vector<8x8xf32>
      %23 = arith.addf %22, %15 : vector<8x8xf32>
      %c0_14 = arith.constant 0 : index
      %c0_15 = arith.constant 0 : index
      %24 = vector.load %arg4[%c0_14, %c0_15] : memref<8x8xf32, #tpu.memory_space<vmem>>, vector<8x8xf32>
      tpu.vector_store %arg4[%c0_14, %c0_15], %23 {strides = array<i32>} : memref<8x8xf32, #tpu.memory_space<vmem>>, vector<8x8xf32>,
    } else {
    }
    return
  }
  func.func @transform_0(%arg0: i32, %arg1: i32) -> (i32, i32, i32) {
    %c0_i32 = arith.constant 0 : i32
    %c0_i32_0 = arith.constant 0 : i32
    return %arg0, %arg1, %c0_i32 : i32, i32, i32
  }
  func.func @transform_1(%arg0: i32, %arg1: i32) -> (i32, i32, i32) {
    %c0_i32 = arith.constant 0 : i32
    %c0_i32_0 = arith.constant 0 : i32
    %c0_i32_1 = arith.constant 0 : i32
    return %arg0, %c0_i32, %c0_i32_0 : i32, i32, i32
  }
  func.func @transform_2(%arg0: i32, %arg1: i32) -> (i32, i32) {
    %c0_i32 = arith.constant 0 : i32
    %c0_i32_0 = arith.constant 0 : i32
    return %arg0, %c0_i32 : i32, i32
  }
}

</mosaic_0001>

<bundles_post_ra>
// kernel: tpu_custom_call.1
= control target key start
LH: loop header
LB: loop body
LE: loop exit
PB: predicated region body
PF: predicated region fallthrough
CT: control target
= control target key end

     0   :  { %7 = vsyncpa [#allocation3], 0  ;;  %s836_s0 = inlined_call_operand.hbm [shape: f32[8,8,8], index: 0, kind: input, shape index: {}]   ;;  %s837_s1 = inlined_call_operand.hbm [shape: f32[8,8,8], index: 1, kind: input, shape index: {}]   ;;  %s838_s2 = inlined_call_operand.hbm [shape: f32[8,8], index: 2, kind: output, shape index: {}]  }
   0x1   :  { %8 = vsyncpa [#allocation6], 0 }
   0x2   :  { %9 = vsyncpa [#allocation4], 0  ;;  %s14_s11 = sshll.u32 %s836_s0, 4  ;;  %s700_s12 = smov [#allocation2]   ;;  %s15_s11 = int_to_ptr.hbm [resolvable:$true] %s14_s11 }
   0x3   :  { %s16_s13 = sshll.u32 %s700_s12, 4  ;;  %s27_s16 = sshll.u32 %s837_s1, 4  ;;  %s17_s13 = int_to_ptr.vmem [resolvable:$true] %s16_s13  ;;  %s28_s16 = int_to_ptr.hbm [resolvable:$true] %s27_s16 }
   0x4   :  { %s701_s17 = smov 128   ;;  %s702_s18 = smov 8  }
   0x5   :  { %22 = dma.hbm_to_vmem [thread:$0]  %s15_s11, 1024, %s17_s13, [#allocation3], %s701_s17, %s701_s17, %s702_s18  }
   0x6   :  { %s703_s19 = smov [#allocation5]  }
   0x7   :  { %s29_s20 = sshll.u32 %s703_s19, 4  ;;  %s30_s20 = int_to_ptr.vmem [resolvable:$true] %s29_s20 }
   0x8   :  { %35 = dma.hbm_to_vmem [thread:$0]  %s28_s16, 1024, %s30_s20, [#allocation6], %s701_s17, %s701_s17, %s702_s18  }
   0x9   :  { %694 = dma.done.wait [#allocation3], 1024  }
   0xa   :  { %695 = vsyncadd [#allocation3], 4294966272 }
   0xb   :  { %696 = dma.done.wait [#allocation6], 1024  }
   0xc   :  { %697 = vsyncadd [#allocation6], 4294966272  ;;  %v60_v0 = vld [vmem:[#allocation5] sm:$0xff]  ;;  %v62_v1 = vld [vmem:[#allocation5 + $0x10] sm:$0xff]  ;;  %vm68_vm0 = vcmask 64512   ;;  %s704_s0 = smov [#allocation7]  }
   0xd   :  { %v44_v2 = vld [vmem:[#allocation2] sm:$0xff]  ;;  %87 = vmatpush.msra.mxu0 %v60_v0  ;;  %133 = vmatpush.msra.mxu2 %v62_v1  ;;  %v46_v4 = vld [vmem:[#allocation2 + $0x10] sm:$0xff]  ;;  %v61_v6 = vld [vmem:[#allocation5 + $0x8] sm:$0xff]  ;;  %s564_s1 = sshll.u32 %s704_s0, 4  ;;  %s566_s23 = sshll.u32 %s838_s2, 4  ;;  %s565_s1 = int_to_ptr.vmem [resolvable:$true] %s564_s1  ;;  %s567_s23 = int_to_ptr.hbm [resolvable:$true] %s566_s23 }
   0xe   :  { %v52_v3 = vmul.f32 2.828427, %v44_v2  ;;  %v64_v5 = vld [vmem:[#allocation5 + $0x20] sm:$0xff]  ;;  %v54_v7 = vmul.f32 2.828427, %v46_v4  ;;  %110 = vmatpush.msra.mxu1 %v61_v6  ;;  %v63_v8 = vld [vmem:[#allocation5 + $0x18] sm:$0xff] }
   0xf   :  { %179 = vmatpush.msrb.mxu0 %v64_v5  ;;  %v45_v9 = vld [vmem:[#allocation2 + $0x8] sm:$0xff]  ;;  %v47_v10 = vld [vmem:[#allocation2 + $0x18] sm:$0xff]  ;;  %156 = vmatpush.msra.mxu3 %v63_v8  ;;  %v66_v13 = vld [vmem:[#allocation5 + $0x30] sm:$0xff] }
  0x10   :  { %577 = vmatmul.msk.f32.vlgmr.msra.gmra.mxu0 %vm68_vm0, %v52_v3  ;;  %v53_v11 = vmul.f32 2.828427, %v45_v9  ;;  %v55_v12 = vmul.f32 2.828427, %v47_v10  ;;  %579 = vmatmul.msk.f32.vlgmr.msra.gmra.mxu2 %vm68_vm0, %v54_v7  ;;  %v48_v14 = vld [vmem:[#allocation2 + $0x20] sm:$0xff]  ;;  %v67_v15 = vld [vmem:[#allocation5 + $0x38] sm:$0xff] }
  0x11   :  { %v65_v16 = vld [vmem:[#allocation5 + $0x28] sm:$0xff]  ;;  %v50_v17 = vld [vmem:[#allocation2 + $0x30] sm:$0xff]  ;;  %225 = vmatpush.msrb.mxu2 %v66_v13  ;;  %248 = vmatpush.msrb.mxu3 %v67_v15  ;;  %v51_v19 = vld [vmem:[#allocation2 + $0x38] sm:$0xff]  ;;  %v56_v20 = vmul.f32 2.828427, %v48_v14 }
  0x12   :  { %578 = vmatmul.msk.f32.vlgmr.msra.gmra.mxu1 %vm68_vm0, %v53_v11  ;;  %580 = vmatmul.msk.f32.vlgmr.msra.gmra.mxu3 %vm68_vm0, %v55_v12  ;;  %v49_v18 = vld [vmem:[#allocation2 + $0x28] sm:$0xff]  ;;  %v58_v21 = vmul.f32 2.828427, %v50_v17  ;;  %v59_v23 = vmul.f32 2.828427, %v51_v19 }
  0x13   :  { %202 = vmatpush.msrb.mxu1 %v65_v16  ;;  %v57_v22 = vmul.f32 2.828427, %v49_v18 }
  0x18   :  { %581 = vmatmul.msk.f32.vlgmr.msrb.gmra.mxu0 %vm68_vm0, %v56_v20  ;;  %583 = vmatmul.msk.f32.vlgmr.msrb.gmra.mxu2 %vm68_vm0, %v58_v21 }
  0x1a   :  { %582 = vmatmul.msk.f32.vlgmr.msrb.gmra.mxu1 %vm68_vm0, %v57_v22  ;;  %584 = vmatmul.msk.f32.vlgmr.msrb.gmra.mxu3 %vm68_vm0, %v59_v23 }
  0x8d   :  { %v89_v24 = vpop.f32.mrf.mxu0 }
  0x8e   :  { %v253_v25 = vsel %vm68_vm0, %v89_v24, -inf }
  0x8f   :  { %254 = vmax.xlane.f32.xlu0 %v253_v25  ;;  %v112_v26 = vpop.f32.mrf.mxu1 }
  0x90   :  { %v256_v28 = vsel %vm68_vm0, %v112_v26, -inf }
  0x93   :  { %v135_v27 = vpop.f32.mrf.mxu2 }
  0x94   :  { %v259_v29 = vsel %vm68_vm0, %v135_v27, -inf }
  0x95   :  { %v181_v30 = vpop.f32.mrf.mxu0  ;;  %260 = vmax.xlane.f32.xlu1 %v259_v29  ;;  %v158_v32 = vpop.f32.mrf.mxu3 }
  0x96   :  { %v265_v31 = vsel %vm68_vm0, %v181_v30, -inf  ;;  %v262_v34 = vsel %vm68_vm0, %v158_v32, -inf }
  0x97   :  { %257 = vmax.xlane.f32.xlu0 %v256_v28  ;;  %266 = vmax.xlane.f32.xlu2 %v265_v31  ;;  %v204_v33 = vpop.f32.mrf.mxu1 }
  0x98   :  { %v268_v36 = vsel %vm68_vm0, %v204_v33, -inf }
  0x9b   :  { %v227_v35 = vpop.f32.mrf.mxu2 }
  0x9c   :  { %v271_v37 = vsel %vm68_vm0, %v227_v35, -inf }
  0x9d   :  { %263 = vmax.xlane.f32.xlu1 %v262_v34  ;;  %v250_v38 = vpop.f32.mrf.mxu3 }
  0x9e   :  { %v274_v39 = vsel %vm68_vm0, %v250_v38, -inf }
  0x9f   :  { %272 = vmax.xlane.f32.xlu0 %v271_v37  ;;  %269 = vmax.xlane.f32.xlu2 %v268_v36 }
  0xa5   :  { %275 = vmax.xlane.f32.xlu1 %v274_v39 }
 0x102   :  { %v255_v40 = vpop.xlane.xlu0 %254 }
 0x103   :  { %v277_v41 = vsub.f32 %v89_v24, %v255_v40 }
 0x105   :  { %v285_v42 = vmul.f32 1.442695, %v277_v41 }
 0x107   :  { %590 = vpow2.f32 %v285_v42 }
 0x108   :  { %v261_v43 = vpop.xlane.xlu1 %260 }
 0x109   :  { %v279_v44 = vsub.f32 %v135_v27, %v261_v43 }
 0x10a   :  { %v258_v45 = vpop.xlane.xlu0 %257  ;;  %v267_v46 = vpop.xlane.xlu2 %266 }
 0x10b   :  { %v278_v47 = vsub.f32 %v112_v26, %v258_v45  ;;  %v289_v48 = vmul.f32 1.442695, %v279_v44  ;;  %v281_v51 = vsub.f32 %v181_v30, %v267_v46 }
 0x10d   :  { %v742_v49 = vpop.eup %590  ;;  %v287_v50 = vmul.f32 1.442695, %v278_v47  ;;  %592 = vpow2.f32 %v289_v48  ;;  %v293_v53 = vmul.f32 1.442695, %v281_v51 }
 0x10e   :  { %v301_v52 = vsel %vm68_vm0, %v742_v49, 0.0 }
 0x10f   :  { %594 = vpow2.f32 %v287_v50  ;;  %302 = vadd.xlane.f32.xlu2 %v301_v52 }
 0x110   :  { %v264_v54 = vpop.xlane.xlu1 %263  ;;  %596 = vpow2.f32 %v293_v53 }
 0x111   :  { %v280_v55 = vsub.f32 %v158_v32, %v264_v54 }
 0x112   :  { %v273_v56 = vpop.xlane.xlu0 %272  ;;  %v270_v57 = vpop.xlane.xlu2 %269 }
 0x113   :  { %v282_v58 = vsub.f32 %v204_v33, %v270_v57  ;;  %v746_v59 = vpop.eup %592  ;;  %v291_v60 = vmul.f32 1.442695, %v280_v55  ;;  %v283_v61 = vsub.f32 %v227_v35, %v273_v56 }
 0x114   :  { %v307_v0 = vsel %vm68_vm0, %v746_v59, 0.0 }
 0x115   :  { %v748_v62 = vpop.eup %594  ;;  %v295_v63 = vmul.f32 1.442695, %v282_v58  ;;  %598 = vpow2.f32 %v291_v60  ;;  %308 = vadd.xlane.f32.xlu1 %v307_v0  ;;  %v297_v2 = vmul.f32 1.442695, %v283_v61 }
 0x116   :  { %v304_v1 = vsel %vm68_vm0, %v748_v62, 0.0  ;;  %v754_v5 = vpop.eup %596 }
 0x117   :  { %305 = vadd.xlane.f32.xlu0 %v304_v1  ;;  %600 = vpow2.f32 %v295_v63  ;;  %v313_v10 = vsel %vm68_vm0, %v754_v5, 0.0 }
 0x118   :  { %v276_v3 = vpop.xlane.xlu1 %275  ;;  %602 = vpow2.f32 %v297_v2 }
 0x119   :  { %v284_v4 = vsub.f32 %v250_v38, %v276_v3 }
 0x11b   :  { %v756_v6 = vpop.eup %598  ;;  %v299_v7 = vmul.f32 1.442695, %v284_v4 }
 0x11c   :  { %v310_v8 = vsel %vm68_vm0, %v756_v6, 0.0 }
 0x11d   :  { %v760_v9 = vpop.eup %600  ;;  %604 = vpow2.f32 %v299_v7  ;;  %311 = vadd.xlane.f32.xlu2 %v310_v8 }
 0x11e   :  { %v316_v11 = vsel %vm68_vm0, %v760_v9, 0.0  ;;  %v766_v12 = vpop.eup %602 }
 0x11f   :  { %314 = vadd.xlane.f32.xlu0 %v313_v10  ;;  %317 = vadd.xlane.f32.xlu1 %v316_v11  ;;  %v319_v14 = vsel %vm68_vm0, %v766_v12, 0.0 }
 0x123   :  { %v768_v13 = vpop.eup %604 }
 0x124   :  { %v322_v15 = vsel %vm68_vm0, %v768_v13, 0.0 }
 0x125   :  { %320 = vadd.xlane.f32.xlu2 %v319_v14 }
 0x127   :  { %323 = vadd.xlane.f32.xlu0 %v322_v15 }
 0x182   :  { %v303_v16 = vpop.xlane.xlu2 %302 }
 0x183   :  { %606 = vrcp.f32 %v303_v16  ;;  %v336_v23 = vand.u32 2147483648, %v303_v16  ;;  %vm330_vm2 = vweird.f32 %v303_v16  ;;  %v334_v26 = vand.u32 2147483647, %v303_v16 }
 0x185   :  { %v337_v33 = vor.u32 1.1754944e-38, %v336_v23  ;;  %vm335_vm4 = vcmp.eq.f32.partialorder %v334_v26, 8.507059e+37 }
 0x188   :  { %v309_v18 = vpop.xlane.xlu1 %308 }
 0x189   :  { %v607_v17 = vpop.eup %606  ;;  %608 = vrcp.f32 %v309_v18  ;;  %v362_v35 = vand.u32 2147483647, %v309_v18  ;;  %v364_v41 = vand.u32 2147483648, %v309_v18  ;;  %vm358_vm7 = vweird.f32 %v309_v18 }
 0x18a   :  { %v326_v19 = vmul.f32 %v607_v17, %v303_v16  ;;  %v306_v20 = vpop.xlane.xlu0 %305  ;;  %vm331_vm1 = vweird.f32 %v607_v17 }
 0x18b   :  { %610 = vrcp.f32 %v306_v20  ;;  %vm332_vm3 = vmor %vm330_vm2, %vm331_vm1  ;;  %v350_v40 = vand.u32 2147483648, %v306_v20  ;;  %v348_v43 = vand.u32 2147483647, %v306_v20  ;;  %vm344_vm9 = vweird.f32 %v306_v20 }
 0x18c   :  { %v327_v21 = vsub.f32 1.0, %v326_v19  ;;  %vm363_vm10 = vcmp.eq.f32.partialorder %v362_v35, 8.507059e+37  ;;  %v365_v55 = vor.u32 1.1754944e-38, %v364_v41 }
 0x18d   :  { %v351_v52 = vor.u32 1.1754944e-38, %v350_v40  ;;  %vm349_vm12 = vcmp.eq.f32.partialorder %v348_v43, 8.507059e+37 }
 0x18e   :  { %v328_v22 = vmul.f32 %v607_v17, %v327_v21 }
 0x18f   :  { %v609_v24 = vpop.eup %608 }
 0x190   :  { %v329_v25 = vadd.f32 %v607_v17, %v328_v22  ;;  %v354_v28 = vmul.f32 %v609_v24, %v309_v18  ;;  %v312_v29 = vpop.xlane.xlu2 %311  ;;  %vm359_vm5 = vweird.f32 %v609_v24 }
 0x191   :  { %v611_v27 = vpop.eup %610  ;;  %612 = vrcp.f32 %v312_v29  ;;  %v376_v45 = vand.u32 2147483647, %v312_v29  ;;  %vm781_vm8 = vmor %vm358_vm7, %vm359_vm5  ;;  %v378_v57 = vand.u32 2147483648, %v312_v29  ;;  %vm372_vm13 = vweird.f32 %v312_v29 }
 0x192   :  { %v333_v30 = vsel %vm332_vm3, %v607_v17, %v329_v25  ;;  %v340_v31 = vmul.f32 %v611_v27, %v306_v20  ;;  %v774_v32 = vpop.xlane.xlu0 %314  ;;  %v355_v34 = vsub.f32 1.0, %v354_v28  ;;  %v777_v37 = vpop.xlane.xlu1 %317  ;;  %vm345_vm6 = vweird.f32 %v611_v27 }
 0x193   :  { %614 = vrcp.f32 %v774_v32  ;;  %v338_v38 = vsel %vm335_vm4, %v337_v33, %v333_v30  ;;  %vm346_vm11 = vmor %vm344_vm9, %vm345_vm6  ;;  %vm789_vm14 = vcmp.eq.f32.partialorder %v376_v45, 8.507059e+37  ;;  %v390_v7 = vand.u32 2147483647, %v774_v32 }
 0x194   :  { %v341_v36 = vsub.f32 1.0, %v340_v31  ;;  %v356_v39 = vmul.f32 %v609_v24, %v355_v34  ;;  %616 = vrcp.f32 %v777_v37  ;;  %v437_v47 = vmul.f32 %v742_v49, %v338_v38 }
 0x195   :  { %v379_v8 = vor.u32 1.1754944e-38, %v378_v57  ;;  %vm386_vm1 = vweird.f32 %v774_v32  ;;  %vm804_vm4 = vcmp.eq.f32.partialorder %v390_v7, 8.507059e+37  ;;  %v404_v22 = vand.u32 2147483647, %v777_v37 }
 0x196   :  { %v342_v42 = vmul.f32 %v611_v27, %v341_v36  ;;  %v357_v44 = vadd.f32 %v609_v24, %v356_v39  ;;  %v445_v63 = vsel %vm68_vm0, %v437_v47, 0.0  ;;  %v406_v23 = vand.u32 2147483648, %v777_v37 }
 0x197   :  { %v613_v46 = vpop.eup %612  ;;  %v446_v14 = vrot.slane %v445_v63, 4  ;;  %vm400_vm7 = vweird.f32 %v777_v37  ;;  %vm405_vm9 = vcmp.eq.f32.partialorder %v404_v22, 8.507059e+37 }
 0x198   :  { %v343_v50 = vadd.f32 %v611_v27, %v342_v42  ;;  %v361_v51 = vsel %vm781_vm8, %v609_v24, %v357_v44  ;;  %v368_v53 = vmul.f32 %v613_v46, %v312_v29  ;;  %v787_v58 = vpop.xlane.xlu2 %320  ;;  %vm373_vm15 = vweird.f32 %v613_v46 }
 0x199   :  { %v615_v54 = vpop.eup %614  ;;  %v366_v0 = vsel %vm363_vm10, %v365_v55, %v361_v51  ;;  %618 = vrcp.f32 %v787_v58  ;;  %vm374_vm2 = vmor %vm372_vm13, %vm373_vm15  ;;  %v407_v38 = vor.u32 1.1754944e-38, %v406_v23  ;;  %v420_v47 = vand.u32 2147483648, %v787_v58 }
 0x19a   :  { %v347_v56 = vsel %vm346_vm11, %v611_v27, %v343_v50  ;;  %v369_v60 = vsub.f32 1.0, %v368_v53  ;;  %v382_v2 = vmul.f32 %v615_v54, %v774_v32  ;;  %v617_v3 = vpop.eup %616  ;;  %v439_v15 = vmul.f32 %v746_v59, %v366_v0 }
 0x19b   :  { %v352_v49 = vsel %vm349_vm12, %v351_v52, %v347_v56  ;;  %v396_v11 = vmul.f32 %v617_v3, %v777_v37  ;;  %vm387_vm3 = vweird.f32 %v615_v54  ;;  %vm401_vm5 = vweird.f32 %v617_v3 }
 0x19c   :  { %v438_v1 = vmul.f32 %v748_v62, %v352_v49  ;;  %v370_v4 = vmul.f32 %v613_v46, %v369_v60  ;;  %v383_v10 = vsub.f32 1.0, %v382_v2  ;;  %v392_v62 = vand.u32 2147483648, %v774_v32  ;;  %vm388_vm6 = vmor %vm386_vm1, %vm387_vm3  ;;  %v324_v32 = vpop.xlane.xlu0 %323 }
 0x19d   :  { %v397_v19 = vsub.f32 1.0, %v396_v11  ;;  %v459_v27 = vsel %vm68_vm0, %v439_v15, 0.0  ;;  %vm402_vm8 = vmor %vm400_vm7, %vm401_vm5  ;;  %v447_v37 = vadd.f32 %v446_v14, %v445_v63  ;;  %v418_v50 = vand.u32 2147483647, %v787_v58 }
 0x19e   :  { %v371_v16 = vadd.f32 %v613_v46, %v370_v4  ;;  %v452_v17 = vsel %vm68_vm0, %v438_v1, 0.0  ;;  %v384_v18 = vmul.f32 %v615_v54, %v383_v10  ;;  %v393_v30 = vor.u32 1.1754944e-38, %v392_v62 }
 0x19f   :  { %v398_v25 = vmul.f32 %v617_v3, %v397_v19  ;;  %v619_v26 = vpop.eup %618  ;;  %v453_v28 = vrot.slane %v452_v17, 4  ;;  %v460_v39 = vrot.slane %v459_v27, 4  ;;  %620 = vrcp.f32 %v324_v32 }
 0x1a0   :  { %v375_v20 = vsel %vm374_vm2, %v613_v46, %v371_v16  ;;  %v385_v24 = vadd.f32 %v615_v54, %v384_v18  ;;  %v410_v34 = vmul.f32 %v619_v26, %v787_v58  ;;  %vm415_vm10 = vweird.f32 %v619_v26 }
 0x1a1   :  { %v380_v59 = vsel %vm789_vm14, %v379_v8, %v375_v20  ;;  %v399_v33 = vadd.f32 %v617_v3, %v398_v25  ;;  %v454_v41 = vadd.f32 %v453_v28, %v452_v17  ;;  %vm414_vm11 = vweird.f32 %v787_v58 }
 0x1a2   :  { %v440_v29 = vmul.f32 %v756_v6, %v380_v59  ;;  %v389_v31 = vsel %vm388_vm6, %v615_v54, %v385_v24  ;;  %v411_v44 = vsub.f32 1.0, %v410_v34  ;;  %vm416_vm12 = vmor %vm414_vm11, %vm415_vm10  ;;  %v421_v56 = vor.u32 1.1754944e-38, %v420_v47 }
 0x1a3   :  { %v394_v36 = vsel %vm804_vm4, %v393_v30, %v389_v31  ;;  %v403_v40 = vsel %vm402_vm8, %v617_v3, %v399_v33  ;;  %v455_v53 = vrot.slane %v454_v41, 2  ;;  %v448_v57 = vrot.slane %v447_v37, 2 }
 0x1a4   :  { %v466_v35 = vsel %vm68_vm0, %v440_v29, 0.0  ;;  %v441_v6 = vmul.f32 %v754_v5, %v394_v36  ;;  %v408_v43 = vsel %vm405_vm9, %v407_v38, %v403_v40  ;;  %v412_v48 = vmul.f32 %v619_v26, %v411_v44 }
 0x1a5   :  { %v467_v42 = vrot.slane %v466_v35, 4  ;;  %v442_v46 = vmul.f32 %v760_v9, %v408_v43  ;;  %v461_v5 = vadd.f32 %v460_v39, %v459_v27  ;;  %vm419_vm13 = vcmp.eq.f32.partialorder %v418_v50, 8.507059e+37  ;;  %v621_v63 = vpop.eup %620 }
 0x1a6   :  { %v473_v45 = vsel %vm68_vm0, %v441_v6, 0.0  ;;  %v413_v55 = vadd.f32 %v619_v26, %v412_v48  ;;  %v456_v1 = vadd.f32 %v455_v53, %v454_v41  ;;  %v424_v4 = vmul.f32 %v621_v63, %v324_v32 }
 0x1a7   :  { %v474_v51 = vrot.slane %v473_v45, 4  ;;  %v480_v52 = vsel %vm68_vm0, %v442_v46, 0.0  ;;  %v468_v54 = vadd.f32 %v467_v42, %v466_v35  ;;  %v462_v0 = vrot.slane %v461_v5, 2 }
 0x1a8   :  { %v481_v9 = vrot.slane %v480_v52, 4  ;;  %v417_v49 = vsel %vm416_vm12, %v619_v26, %v413_v55  ;;  %v449_v7 = vadd.f32 %v448_v57, %v447_v37  ;;  %v425_v14 = vsub.f32 1.0, %v424_v4 }
 0x1a9   :  { %v475_v60 = vadd.f32 %v474_v51, %v473_v45  ;;  %v422_v61 = vsel %vm419_vm13, %v421_v56, %v417_v49  ;;  %v469_v2 = vrot.slane %v468_v54, 2  ;;  %v463_v15 = vadd.f32 %v462_v0, %v461_v5 }
 0x1aa   :  { %v443_v3 = vmul.f32 %v766_v12, %v422_v61  ;;  %v482_v8 = vadd.f32 %v481_v9, %v480_v52  ;;  %v457_v16 = vrot.slane %v456_v1, 1  ;;  %v434_v17 = vand.u32 2147483648, %v324_v32 }
 0x1ab   :  { %v476_v58 = vrot.slane %v475_v60, 2  ;;  %v470_v62 = vadd.f32 %v469_v2, %v468_v54  ;;  %v426_v19 = vmul.f32 %v621_v63, %v425_v14  ;;  %vm429_vm14 = vweird.f32 %v621_v63 }
 0x1ac   :  { %v487_v10 = vsel %vm68_vm0, %v443_v3, 0.0  ;;  %v432_v20 = vand.u32 2147483647, %v324_v32  ;;  %v450_v21 = vrot.slane %v449_v7, 1  ;;  %v483_v22 = vrot.slane %v482_v8, 2 }
 0x1ad   :  { %v488_v11 = vrot.slane %v487_v10, 4  ;;  %v477_v23 = vadd.f32 %v476_v58, %v475_v60  ;;  %v427_v59 = vadd.f32 %v621_v63, %v426_v19  ;;  %vm428_vm15 = vweird.f32 %v324_v32 }
 0x1ae   :  { %v458_v24 = vadd.f32 %v457_v16, %v456_v1  ;;  %v471_v25 = vrot.slane %v470_v62, 1  ;;  %vm430_vm1 = vmor %vm428_vm15, %vm429_vm14  ;;  %v435_v26 = vor.u32 1.1754944e-38, %v434_v17  ;;  %v464_v27 = vrot.slane %v463_v15, 1 }
 0x1af   :  { %v489_v18 = vadd.f32 %v488_v11, %v487_v10  ;;  %v431_v28 = vsel %vm430_vm1, %v621_v63, %v427_v59  ;;  %vm433_vm2 = vcmp.eq.f32.partialorder %v432_v20, 8.507059e+37  ;;  %vm513_vm3 = vcmask 1041409  }
 0x1b0   :  { %v451_v29 = vadd.f32 %v450_v21, %v449_v7  ;;  %v484_v30 = vadd.f32 %v483_v22, %v482_v8  ;;  %v436_v31 = vsel %vm433_vm2, %v435_v26, %v431_v28  ;;  %v478_v34 = vrot.slane %v477_v23, 1 }
 0x1b1   :  { %v490_v12 = vrot.slane %v489_v18, 2  ;;  %v444_v33 = vmul.f32 %v768_v13, %v436_v31  ;;  %v472_v36 = vadd.f32 %v471_v25, %v470_v62  ;;  %vm515_vm4 = vcmask 1042434  }
 0x1b2   :  { %v514_v38 = vsel %vm513_vm3, %v458_v24, %v451_v29  ;;  %v465_v39 = vadd.f32 %v464_v27, %v463_v15  ;;  %vm517_vm5 = vcmask 1043459   ;;  %v485_v40 = vrot.slane %v484_v30, 1 }
 0x1b3   :  { %v491_v35 = vadd.f32 %v490_v12, %v489_v18  ;;  %v494_v6 = vsel %vm68_vm0, %v444_v33, 0.0  ;;  %v479_v41 = vadd.f32 %v478_v34, %v477_v23  ;;  %vm519_vm6 = vcmask 1044484  }
 0x1b4   :  { %v495_v32 = vrot.slane %v494_v6, 4  ;;  %v516_v43 = vsel %vm515_vm4, %v465_v39, %v514_v38  ;;  %v486_v45 = vadd.f32 %v485_v40, %v484_v30  ;;  %vm521_vm7 = vcmask 1045509  }
 0x1b5   :  { %v492_v42 = vrot.slane %v491_v35, 1  ;;  %v518_v37 = vsel %vm517_vm5, %v472_v36, %v516_v43  ;;  %vm523_vm8 = vcmask 1046534   ;;  %vm525_vm9 = vcmask 1047559  }
 0x1b6   :  { %v496_v44 = vadd.f32 %v495_v32, %v494_v6  ;;  %v520_v47 = vsel %vm519_vm6, %v479_v41, %v518_v37 }
 0x1b7   :  { %v493_v13 = vadd.f32 %v492_v42, %v491_v35  ;;  %v522_v5 = vsel %vm521_vm7, %v486_v45, %v520_v47 }
 0x1b8   :  { %v497_v46 = vrot.slane %v496_v44, 2 }
 0x1b9   :  { %v524_v51 = vsel %vm523_vm8, %v493_v13, %v522_v5 }
 0x1ba   :  { %v498_v48 = vadd.f32 %v497_v46, %v496_v44 }
 0x1bc   :  { %v499_v50 = vrot.slane %v498_v48, 1 }
 0x1be   :  { %v500_v52 = vadd.f32 %v499_v50, %v498_v48 }
 0x1c0   :  { %v526_v53 = vsel %vm525_vm9, %v500_v52, %v524_v51 }
 0x1c1   :  { %528 = vst.msk [vmem:[#allocation7] sm:$0xff] %vm68_vm0, %v526_v53 }
 0x1c2   :  { %569 = dma.vmem_to_hbm [thread:$0]  %s565_s1, 128, %s567_s23, [#allocation4]  }
 0x1c3   :  { %698 = dma.done.wait [#allocation4], 128  }
 0x1c4   :  { %699 = vsyncadd [#allocation4], 4294967168 }
 0x1c5   :  { %574 = vsyncpa [#allocation3], 1 }
 0x1c6   :  { %575 = vsyncpa [#allocation6], 1 }
 0x1c7   :  { %576 = vsyncpa [#allocation4], 1 }

</bundles_post_ra>
